<compile_context>
chip_gen: v6e
topology: v6e:2x2x1
jax: 0.10.0
libtpu: 0.0.40
codegen_flags: <defaults>
</compile_context>

<pallas_src>
import math

import jax
import jax.numpy as jnp
from jax.experimental import pallas as pl
from jax.experimental.pallas import tpu as pltpu


def _round_up(x, m):
    return (x + m - 1) // m * m


def _grb_kernel(dist_ref, p_ref, out_ref):
    # dist_ref: (TM, 1) f32 ; p_ref: (8, Dp) f32 (rows 0,1,2 = a, b, w)
    # out_ref:  (TM, Dp)
    a = p_ref[0:1, :]
    b = p_ref[1:2, :]
    w = p_ref[2:3, :]
    z = dist_ref[...] * a - b                               # (TM, Dp)
    out_ref[...] = (jnp.exp(-(z * z)) * w).astype(out_ref.dtype)


def _choose_tile_m(n, dp, out_itemsize, tile_m=None):
    """Pick a row-tile size for a writeback-bound (n, dp) output."""
    row_align = 16 if out_itemsize < 4 else 8        # bf16 min tile is (16, 128)
    n_rows = _round_up(max(int(n), 1), row_align)
    if tile_m is None:
        # ~2 MiB output blocks: big enough for ~85%+ of HBM roofline,
        # small enough to double-buffer comfortably on v7x.
        tile_m = (2 << 20) // max(dp * out_itemsize, 1)
    tile_m = _round_up(max(int(tile_m), row_align), row_align)
    # VMEM budget: 2x output block + 2x lane-padded (tile_m, 128) f32 dist <= ~24 MiB.
    bytes_per_row = 2 * (dp * out_itemsize + 128 * 4)
    cap_rows = max(row_align, ((24 << 20) // bytes_per_row) // row_align * row_align)
    tile_m = min(tile_m, cap_rows, n_rows)
    # Keep >= 2 grid steps when the problem permits, so both v7x TensorCores
    # get work and the pipeline can overlap prefetch/writeback with compute.
    if n_rows >= 2 * row_align:
        tile_m = min(tile_m, _round_up(-(-n_rows // 2), row_align))
    return tile_m


def gaussian_radial_basis(dist, mean, std_logit, weight_logit, *, dim, max_val,
                          min_val=0.0, tile_m=None, out_dtype=jnp.float32):
    """dist: (N,) f32 -> (N, dim), matching GaussianRadialBasis.forward.

    Prefer dim as a multiple of 128 (lane-dense output, no trim copy) and
    out_dtype=bfloat16 when the consumer tolerates it (halves HBM writeback,
    which is the roofline).
    """
    N = int(dist.shape[0])
    dim = int(dim)
    weight_cap = 4.0 * math.sqrt(dim)
    inv_range = 1.0 / (float(max_val) - float(min_val))

    # ---- hoisted (1, dim) parameter transforms, executed once outside kernel ----
    mean = mean.astype(jnp.float32).reshape(1, dim)
    std = jax.nn.softplus(std_logit.astype(jnp.float32).reshape(1, dim)) + 1e-5
    weight = jax.nn.sigmoid(weight_logit.astype(jnp.float32).reshape(1, dim)) * weight_cap
    # gaussian: exp(-0.5*(((d-min)/range - mean)/std)^2) == exp(-(d*a - b)^2)
    s = math.sqrt(0.5) / std                     # per-basis 1/std, f32
    a = s * inv_range                            # per-basis scale on raw dist
    b = (float(min_val) * inv_range + mean) * s  # per-basis offset

    # ---- padding: lane-dense dim (x128); N is never padded (ragged last block) ----
    Dp = _round_up(dim, 128)
    out_itemsize = jnp.dtype(out_dtype).itemsize
    tile_m = _choose_tile_m(N, Dp, out_itemsize, tile_m)

    dist2d = dist.astype(jnp.float32).reshape(N, 1)

    # Stack a/b/w into one sublane-tile-aligned (8, Dp) slab (rows 3..7 and
    # padded lanes are zero -> padded output lanes evaluate to exp(0)*0 = 0).
    params = jnp.concatenate([a, b, weight], axis=0)          # (3, dim)
    params = jnp.pad(params, ((0, 8 - 3), (0, Dp - dim)))     # (8, Dp)

    # ---- VMEM accounting (dist block is lane-padded to 128 lanes in VMEM) ----
    vmem_est = (2 * tile_m * Dp * out_itemsize     # double-buffered output blocks
                + 2 * tile_m * 128 * 4             # double-buffered (tile_m, 1) dist
                + 2 * 8 * Dp * 4                   # parameter slab
                + (2 << 20))                       # compiler scratch / slack
    try:
        phys_vmem = int(pltpu.get_tpu_info().vmem_capacity_bytes)
    except Exception:  # pragma: no cover - conservative fallback
        phys_vmem = 64 << 20
    vmem_limit = None
    if vmem_est > (14 << 20):  # v5e scoped default is 16 MiB; raise before hitting it
        vmem_limit = int(min(vmem_est + (4 << 20), int(phys_vmem * 0.9)))

    compiler_params = pltpu.CompilerParams(
        dimension_semantics=("parallel",),   # shards the row grid across TCs on v7x
        vmem_limit_bytes=vmem_limit,
    )

    out = pl.pallas_call(
        _grb_kernel,
        out_shape=jax.ShapeDtypeStruct((N, Dp), out_dtype),
        grid_spec=pltpu.PrefetchScalarGridSpec(
            num_scalar_prefetch=0,
            grid=(pl.cdiv(N, tile_m),),
            in_specs=[
                pl.BlockSpec((tile_m, 1), lambda i: (i, 0)),   # dist rows
                pl.BlockSpec((8, Dp), lambda i: (0, 0)),        # stacked a/b/w
            ],
            out_specs=pl.BlockSpec((tile_m, Dp), lambda i: (i, 0)),
        ),
        compiler_params=compiler_params,
    )(dist2d, params)

    if Dp == dim:
        return out
    # Lane-trim copy only when dim is not a multiple of 128; keep dim lane-dense
    # at the model level (or consume the padded buffer directly) to avoid it.
    return out[:, :dim]


def init_params(dim, max_weight=4.0):
    """Deterministic parameter init matching _GaussianParamModule.__init__."""
    std_logit = jnp.full((1, dim), math.log(math.exp(2.0 / dim) - 1.0),
                         dtype=jnp.float32)
    weight_logit = jnp.full((1, dim), -math.log(max_weight / 1.0 - 1.0),
                            dtype=jnp.float32)
    mean = jnp.linspace(0.0, 1.0, dim + 2, dtype=jnp.float32)[1:-1].reshape(1, dim)
    return mean, std_logit, weight_logit


def reference(dist, mean, std_logit, weight_logit, *, dim, max_val, min_val=0.0):
    """Pure-JAX transcription of the PyTorch forward (source of truth)."""
    weight_cap = 4.0 * math.sqrt(dim)
    x = (dist[:, None] - min_val) / (max_val - min_val)
    std = jax.nn.softplus(std_logit) + 1e-5
    weight = jax.nn.sigmoid(weight_logit) * weight_cap
    return jnp.exp(-0.5 * ((x - mean) / std) ** 2) * weight


def _run_case(key, dim, N, max_val, min_val):
    dist = jax.random.uniform(key, (N,), dtype=jnp.float32,
                              minval=min_val, maxval=max_val)
    mean, std_logit, weight_logit = init_params(dim)
    out = gaussian_radial_basis(dist, mean, std_logit, weight_logit,
                                dim=dim, max_val=max_val, min_val=min_val)
    out = jax.block_until_ready(out)
    ref = reference(dist, mean, std_logit, weight_logit,
                    dim=dim, max_val=max_val, min_val=min_val)
    assert out.shape == (N, dim), (out.shape, (N, dim))
    assert jnp.allclose(out, ref, atol=2e-5, rtol=2e-5), \
        float(jnp.max(jnp.abs(out - ref)))


if __name__ == "__main__":
    key = jax.random.PRNGKey(0)
    max_val, min_val = 10.0, 0.0

    # Case 1 (preferred layout): dim multiple of 128 -> lane-dense output, no
    # trim copy; N not a multiple of the row tile -> exercises the ragged
    # last-block path (no row padding / no garbage writeback).
    _run_case(key, dim=128, N=100, max_val=max_val, min_val=min_val)

    # Case 2: dim not a multiple of 128 -> exercises lane padding + trim path.
    _run_case(jax.random.fold_in(key, 1), dim=80, N=50,
              max_val=max_val, min_val=min_val)

    print("KERNEL_OK")
</pallas_src>

<mosaic_0001>
module attributes {stable_mosaic.version = 11 : i64} {
  func.func @_grb_kernel(%arg0: i32, %arg1: memref<56x1xf32, #tpu.memory_space<vmem>>, %arg2: memref<8x128xf32, #tpu.memory_space<vmem>>, %arg3: memref<56x128xf32, #tpu.memory_space<vmem>>) attributes {dimension_semantics = [#tpu.dimension_semantics<parallel>], iteration_bounds = array<i64: 2>, scalar_prefetch = 0 : i64, scratch_operands = 0 : i64, tpu.core_type = #tpu.core_type<tc>, window_params = [{transform_indices = @transform_0, window_bounds = array<i64: 56, 1>}, {pipeline_mode = #tpu.pipeline_mode<synchronous>, transform_indices = @transform_1, window_bounds = array<i64: 8, 128>}, {transform_indices = @transform_2, window_bounds = array<i64: 56, 128>}]} {
    %c0 = arith.constant 0 : index
    %c0_0 = arith.constant 0 : index
    %0 = vector.load %arg2[%c0, %c0_0] : memref<8x128xf32, #tpu.memory_space<vmem>>, vector<1x128xf32>
    %c1 = arith.constant 1 : index
    %c0_1 = arith.constant 0 : index
    %1 = vector.load %arg2[%c1, %c0_1] : memref<8x128xf32, #tpu.memory_space<vmem>>, vector<1x128xf32>
    %c2 = arith.constant 2 : index
    %c0_2 = arith.constant 0 : index
    %2 = vector.load %arg2[%c2, %c0_2] : memref<8x128xf32, #tpu.memory_space<vmem>>, vector<1x128xf32>
    %c0_3 = arith.constant 0 : index
    %c0_4 = arith.constant 0 : index
    %3 = vector.load %arg1[%c0_3, %c0_4] : memref<56x1xf32, #tpu.memory_space<vmem>>, vector<56x1xf32>
    %4 = vector.broadcast %3 : vector<56x1xf32> to vector<56x128xf32>
    %5 = vector.broadcast %0 : vector<1x128xf32> to vector<56x128xf32>
    %6 = arith.mulf %4, %5 : vector<56x128xf32>
    %7 = vector.broadcast %1 : vector<1x128xf32> to vector<56x128xf32>
    %8 = arith.subf %6, %7 : vector<56x128xf32>
    %9 = arith.mulf %8, %8 : vector<56x128xf32>
    %cst = arith.constant 0.000000e+00 : f32
    %10 = vector.broadcast %cst : f32 to vector<56x128xf32>
    %11 = arith.subf %10, %9 : vector<56x128xf32>
    %12 = math.exp %11 : vector<56x128xf32>
    %13 = vector.broadcast %2 : vector<1x128xf32> to vector<56x128xf32>
    %14 = arith.mulf %12, %13 : vector<56x128xf32>
    %c0_5 = arith.constant 0 : index
    %c0_6 = arith.constant 0 : index
    %15 = vector.load %arg3[%c0_5, %c0_6] : memref<56x128xf32, #tpu.memory_space<vmem>>, vector<56x128xf32>
    tpu.vector_store %arg3[%c0_5, %c0_6], %14 {strides = array<i32>} : memref<56x128xf32, #tpu.memory_space<vmem>>, vector<56x128xf32>,
    return
  }
  func.func @transform_0(%arg0: i32) -> (i32, i32) {
    %c0_i32 = arith.constant 0 : i32
    %c0_i32_0 = arith.constant 0 : i32
    return %arg0, %c0_i32 : i32, i32
  }
  func.func @transform_1(%arg0: i32) -> (i32, i32) {
    %c0_i32 = arith.constant 0 : i32
    %c0_i32_0 = arith.constant 0 : i32
    %c0_i32_1 = arith.constant 0 : i32
    return %c0_i32, %c0_i32_0 : i32, i32
  }
  func.func @transform_2(%arg0: i32) -> (i32, i32) {
    %c0_i32 = arith.constant 0 : i32
    %c0_i32_0 = arith.constant 0 : i32
    return %arg0, %c0_i32 : i32, i32
  }
}

</mosaic_0001>

<bundles_post_ra>
// kernel: tpu_custom_call.1
= control target key start
LH: loop header
LB: loop body
LE: loop exit
PB: predicated region body
PF: predicated region fallthrough
CT: control target
= control target key end

     0   :  { %7 = vsyncpa [#allocation3], 0  ;;  %s658_s0 = inlined_call_operand.vmem [shape: f32[100,1], index: 0, kind: input, shape index: {}]   ;;  %s659_s1 = inlined_call_operand.vmem [shape: f32[8,128], index: 1, kind: input, shape index: {}]   ;;  %s660_s2 = inlined_call_operand.hbm [shape: f32[100,128], index: 2, kind: output, shape index: {}]  }
   0x1   :  { %9 = vsyncpa [#allocation3 + $0x1], 0  ;;  %s519_s9 = smov 0   ;;  %s521_s10 = smov 0  }
   0x2   :  { %s523_s11 = smov 0   ;;  %s525_s12 = smov 0  }
   0x3 LB: > { %s540_s13 = sadd.s32 4294967295, %s498_s12   ;;  %s364_s14 = sadd.s32 4294967294, %s498_s12   ;;  %s498_s12 = sphi %s525_s12, %s666_s12   ;;  %s494_s11 = sphi %s523_s11, %s665_s11   ;;  %s490_s10 = sphi %s521_s10, %s664_s10   ;;  %s486_s9 = sphi %s519_s9, %s663_s9  }
   0x4   : > { %s544_s15 = sadd.s32 1, %s498_s12   ;;  %s69_s16 = sadd.s32 1, %s494_s11 }
   0x5   : > { %s66_s17 = ssub.s32 %s498_s12, %s544_s15  ;;  %p79_p0 = scmp.ne.s32.totalorder %s494_s11, %s490_s10 }
   0x6   : > { %p67_p1 = scmp.eq.s32.totalorder %s66_s17, 0  ;;  %p80_p2 = scmp.eq.s32.totalorder %s540_s13, 1 }
   0x7   : > { %p85_p3 = scmp.ne.s32.totalorder %s490_s10, %s486_s9  ;;  %p86_p4 = scmp.eq.s32.totalorder %s364_s14, 1 }
   0x8   : > { %s555_s18 = scalar_select %p67_p1, %s494_s11, %s69_s16  }
   0x9   : > { %p557_p5 = por %p80_p2, %p79_p0  ;;  %p561_p6 = por %p86_p4, %p85_p3 }
   0xa   : > { %p367_p7 = scmp.ge.s32.totalorder %s498_s12, 1  ;;  %p124_p8 = scmp.lt.s32.totalorder %s498_s12, 3 }
   0xc   : > { %p125_p9 = pnand %p367_p7, %p124_p8 }
   0xd   : > { %s568_s21 = smul.u32 (!%p125_p9), 7, %s540_s13  ;;  %s147_s27 = sand.u32 (!%p125_p9), 1, %s490_s10  }
   0xe   : > { %128 = sbr.rel (%p125_p9) target bundleno = 214 (0xd6), region = 28  ;;  %s598_s8 = scalar_lea.sflag (!%p125_p9), [#allocation3], %s147_s27 }
   0xf   : > { %p155_p10 = scmp.lt.s32.totalorder (!%p125_p9), %s568_s21, 12  ;;  %s380_s4 = smul.u32 (!%p125_p9), 56, %s147_s27 }
  0x11   : > { %s587_s7 = scalar_lea.vmem (!%p125_p9), [#allocation2], %s380_s4 }
  0x13   : > { %v500_v0 = vmov 0   ;;  %s156_s22 = scalar_select %p155_p10, %s568_s21, 12  ;;  %v369_v8 = vld [vmem:[%s659_s1] ss:$0 sm:$0xff]  ;;  %v370_v9 = vld [vmem:[%s659_s1 + $0x1] ss:$0 sm:$0xff] }
  0x14   : > { %423 = vset.pattern.permute.xlu1 %v500_v0  ;;  %422 = vset.pattern.permute.xlu0 %v500_v0  ;;  %v371_v52 = vld [vmem:[%s659_s1 + $0x2] ss:$0 sm:$0xff]  ;;  %s291_s14 = ssub.s32 (%p557_p5), 13, %s568_s21 }
  0x15   : > { %s368_s23 = sshll.u32 %s156_s22, 3  ;;  %p292_p11 = scmp.lt.s32.totalorder (%p557_p5), %s291_s14, 7 }
  0x16   : > { %s158_s26 = scalar_lea.vmem %s658_s0, %s368_s23 }
  0x17   : > { %v174_v1 = vld [vmem:[%s158_s26 + $0x10] sm:$0xff]  ;;  %v172_v2 = vld [vmem:[%s158_s26] sm:$0xff]  ;;  %v175_v3 = vld [vmem:[%s158_s26 + $0x18] sm:$0xff] }
  0x18   : > { %191 = vperm.xlu1 %423, %v174_v1   ;;  %181 = vperm.xlu0 %422, %v172_v2   ;;  %v173_v4 = vld [vmem:[%s158_s26 + $0x8] sm:$0xff]  ;;  %v176_v6 = vld [vmem:[%s158_s26 + $0x20] sm:$0xff]  ;;  %v178_v7 = vld [vmem:[%s158_s26 + $0x30] sm:$0xff] }
  0x19   : > { %v177_v5 = vld [vmem:[%s158_s26 + $0x28] sm:$0xff] }
  0x1c   : > { %196 = vperm.xlu1 %423, %v175_v3   ;;  %186 = vperm.xlu0 %422, %v173_v4  }
  0x20   : > { %206 = vperm.xlu1 %423, %v177_v5   ;;  %201 = vperm.xlu0 %422, %v176_v6  }
  0x24   : > { %211 = vperm.xlu0 %422, %v178_v7  }
  0x93   : > { %v192_v10 = vpop.permute.xlu1 %191  ;;  %v182_v11 = vpop.permute.xlu0 %181 }
  0x94   : > { %v220_v12 = vmul.f32 %v369_v8, %v192_v10  ;;  %v218_v13 = vmul.f32 %v369_v8, %v182_v11 }
  0x96   : > { %v231_v14 = vsub.f32 %v220_v12, %v370_v9  ;;  %v229_v15 = vsub.f32 %v218_v13, %v370_v9 }
  0x97   : > { %v197_v16 = vpop.permute.xlu1 %196  ;;  %v187_v17 = vpop.permute.xlu0 %186 }
  0x98   : > { %v238_v18 = vmul.f32 %v231_v14, %v231_v14  ;;  %v236_v19 = vmul.f32 %v229_v15, %v229_v15  ;;  %v221_v20 = vmul.f32 %v369_v8, %v197_v16  ;;  %v219_v21 = vmul.f32 %v369_v8, %v187_v17 }
  0x9a   : > { %v245_v22 = vsub.f32 0.0, %v238_v18  ;;  %v243_v23 = vsub.f32 0.0, %v236_v19  ;;  %v232_v24 = vsub.f32 %v221_v20, %v370_v9  ;;  %v230_v25 = vsub.f32 %v219_v21, %v370_v9 }
  0x9b   : > { %v207_v26 = vpop.permute.xlu1 %206  ;;  %v202_v27 = vpop.permute.xlu0 %201 }
  0x9c   : > { %v254_v28 = vmul.f32 1.442695, %v245_v22  ;;  %v250_v29 = vmul.f32 1.442695, %v243_v23  ;;  %v239_v30 = vmul.f32 %v232_v24, %v232_v24  ;;  %v237_v31 = vmul.f32 %v230_v25, %v230_v25 }
  0x9d   : > { %v223_v32 = vmul.f32 %v369_v8, %v207_v26  ;;  %v222_v33 = vmul.f32 %v369_v8, %v202_v27 }
  0x9e   : > { %424 = vpow2.f32 %v254_v28  ;;  %v246_v34 = vsub.f32 0.0, %v239_v30  ;;  %v244_v35 = vsub.f32 0.0, %v237_v31 }
  0x9f   : > { %426 = vpow2.f32 %v250_v29  ;;  %v234_v36 = vsub.f32 %v223_v32, %v370_v9  ;;  %v233_v37 = vsub.f32 %v222_v33, %v370_v9  ;;  %v212_v38 = vpop.permute.xlu0 %211 }
  0xa0   : > { %v256_v39 = vmul.f32 1.442695, %v246_v34  ;;  %v252_v40 = vmul.f32 1.442695, %v244_v35  ;;  %v224_v41 = vmul.f32 %v369_v8, %v212_v38 }
  0xa1   : > { %v241_v42 = vmul.f32 %v234_v36, %v234_v36  ;;  %v240_v43 = vmul.f32 %v233_v37, %v233_v37 }
  0xa2   : > { %428 = vpow2.f32 %v256_v39  ;;  %v235_v44 = vsub.f32 %v224_v41, %v370_v9 }
  0xa3   : > { %430 = vpow2.f32 %v252_v40  ;;  %v248_v45 = vsub.f32 0.0, %v241_v42  ;;  %v247_v46 = vsub.f32 0.0, %v240_v43 }
  0xa4   : > { %v242_v47 = vmul.f32 %v235_v44, %v235_v44 }
  0xa5   : > { %v260_v48 = vmul.f32 1.442695, %v248_v45  ;;  %v258_v49 = vmul.f32 1.442695, %v247_v46 }
  0xa6   : > { %v249_v50 = vsub.f32 0.0, %v242_v47 }
  0xa7   : > { %432 = vpow2.f32 %v260_v48 }
  0xa8   : > { %434 = vpow2.f32 %v258_v49  ;;  %v262_v51 = vmul.f32 1.442695, %v249_v50 }
  0xaa   : > { %436 = vpow2.f32 %v262_v51 }
  0xab   : > { %v425_v53 = vpop.eup %424 }
  0xac   : > { %v427_v54 = vpop.eup %426  ;;  %v270_v55 = vmul.f32 %v425_v53, %v371_v52 }
  0xad   : > { %v268_v56 = vmul.f32 %v427_v54, %v371_v52 }
  0xae   : > { %277 = vst [vmem:[%s587_s7 + $0x10] sm:$0xff] %v270_v55 }
  0xaf   : > { %v429_v57 = vpop.eup %428  ;;  %275 = vst [vmem:[%s587_s7] sm:$0xff] %v268_v56 }
  0xb0   : > { %v431_v58 = vpop.eup %430  ;;  %v271_v59 = vmul.f32 %v429_v57, %v371_v52 }
  0xb1   : > { %v269_v60 = vmul.f32 %v431_v58, %v371_v52 }
  0xb2   : > { %278 = vst [vmem:[%s587_s7 + $0x18] sm:$0xff] %v271_v59 }
  0xb3   : > { %276 = vst [vmem:[%s587_s7 + $0x8] sm:$0xff] %v269_v60 }
  0xb4   : > { %v433_v61 = vpop.eup %432 }
  0xb5   : > { %v435_v62 = vpop.eup %434  ;;  %v273_v63 = vmul.f32 %v433_v61, %v371_v52 }
  0xb6   : > { %v272_v0 = vmul.f32 %v435_v62, %v371_v52  ;;  %289 = sbr.rel (!%p557_p5) target bundleno = 214 (0xd6), region = 32 }
  0xb7   : > { %v437_v1 = vpop.eup %436  ;;  %280 = vst [vmem:[%s587_s7 + $0x28] sm:$0xff] %v273_v63 }
  0xb8   : > { %279 = vst [vmem:[%s587_s7 + $0x20] sm:$0xff] %v272_v0  ;;  %v274_v2 = vmul.f32 %v437_v1, %v371_v52 }
  0xba   : > { %281 = vst [vmem:[%s587_s7 + $0x30] sm:$0xff] %v274_v2 }
  0xbb   : > { %s668_s14 = smov (!%p292_p11, %s291_s14), 7 }
  0xbc   : > { %s603_s16 = sshll.u32 %s668_s14, 7 }
  0xbd   : > { %s296_s17 = ssub.s32 896, %s603_s16 }
  0xbe   : > { %297 = vsyncadd %s598_s8, %s296_s17  ;;  %p373_p12 = scmp.ne.s32.totalorder %s603_s16, 0  ;;  %s379_s22 = smul.u32 896, %s540_s13 }
  0xbf   : > { %s302_s23 = sshll.u32 %s587_s7, 4  ;;  %s501_s26 = smov [#allocation2]   ;;  %s615_s23 = int_to_ptr.vmem [resolvable:$true] %s302_s23 }
  0xc0   : > { %s613_s25 = scalar_lea.hbm %s660_s2, %s379_s22  ;;  %s438_s21 = scalar_lea.vmem %s615_s23, %s603_s16 }
  0xc1   : > { %p439_p13 = scmp.ne.s32.totalorder %s615_s23, %s438_s21  ;;  %s442_s27 = sshll.u32 %s501_s26, 4  ;;  %s443_s27 = int_to_ptr.vmem [resolvable:$false] %s442_s27 }
  0xc2   : > { %s444_s13 = scalar_lea.vmem %s443_s27, 1792  ;;  %p445_p2 = scmp.lt.s32.totalorder %s615_s23, %s443_s27 }
  0xc3   : > { %p440_p0 = pnand %p439_p13, %p373_p12  ;;  %p446_p3 = scmp.lt.s32.totalorder %s444_s13, %s438_s21 }
  0xc5   : > { %p441_p1 = pneg %p440_p0  ;;  %p447_p4 = por %p446_p3, %p445_p2 }
  0xc7   : > { %p448_p5 = pnand %p447_p4, %p441_p1 }
  0xc9   : > { %451 = shalt.err (!%p448_p5)
}
  0xca   : > { %s452_s28 = scalar_lea.hbm %s613_s25, %s603_s16  ;;  %s456_s3 = scalar_lea.hbm %s660_s2, 1664 }
  0xcb   : > { %p453_p7 = scmp.ne.s32.totalorder %s613_s25, %s452_s28  ;;  %p457_p10 = scmp.lt.s32.totalorder %s613_s25, %s660_s2 }
  0xcc   : > { %p458_p11 = scmp.lt.s32.totalorder %s456_s3, %s452_s28 }
  0xcd   : > { %p454_p8 = pnand %p453_p7, %p373_p12 }
  0xce   : > { %p459_p13 = por %p458_p11, %p457_p10 }
  0xcf   : > { %p455_p9 = pneg %p454_p8 }
  0xd1   : > { %p460_p0 = pnand %p459_p13, %p455_p9 }
  0xd3   : > { %463 = shalt.err (!%p460_p0)
}
  0xd4   : > { %s502_s6 = smov 128   ;;  %s503_s7 = smov 8  }
  0xd5   : > { %308 = dma.vmem_to_hbm [thread:$0]  (%p373_p12), %s615_s23, %s603_s16, %s613_s25, %s598_s8, %s502_s6, %s502_s6, %s503_s7  }
  0xd6 PF: > { %p386_p1 = scmp.ge.s32.totalorder %s498_s12, 2  ;;  %s317_s14 = sand.u32 1, %s486_s9  }
  0xd7   : > { %s318_s17 = scalar_lea.sflag [#allocation3], %s317_s14 }
  0xd8   : > { %p383_p2 = pnand %p386_p1, %p561_p6 }
  0xda   : > { %p384_p3 = pneg %p383_p2 }
  0xdc   : > { %481 = dma.done.wait (%p384_p3), %s318_s17, 896  }
  0xdd   : > { %483 = vsyncadd (%p384_p3), %s318_s17, 4294966400  ;;  %p12_p4 = scmp.ge.s32.totalorder %s544_s15, 4   ;;  %s663_s9 = smov %s490_s10 }
  0xde   : > { %s664_s10 = smov %s494_s11  ;;  %s665_s11 = smov %s555_s18 }
  0xdf   : > { %s666_s12 = smov %s544_s15  ;;  %14 = sbr.rel (!%p12_p4) target bundleno = 3 (0x3), region = 63 }
  0xe4   :  { %323 = vsyncpa [#allocation3], 1 }
  0xe5   :  { %325 = vsyncpa [#allocation3 + $0x1], 1 }

</bundles_post_ra>
